<compile_context>
chip_gen: v5e
topology: v5e:2x2
jax: 0.10.0
libtpu: 0.0.40
codegen_flags: <defaults>
</compile_context>

<pallas_src>
import jax
import jax.numpy as jnp
from jax.experimental import pallas as pl
from jax.experimental.pallas import tpu as pltpu


def _round_up(a, m):
    return -(-a // m) * m


def _linear_kernel(x_ref, w_ref, b_ref, o_ref):
    # x_ref: (tile_rows, P*D) in x's dtype (f32 or bf16)
    # w_ref: (P*D, P*9) block-diagonal, already transposed -> MXU RHS is (K, N)
    # b_ref: (1, P*9) f32
    # Single MXU matmul with f32 accumulation; no per-tile dtype convert of x.
    acc = jnp.dot(x_ref[...], w_ref[...], preferred_element_type=jnp.float32)
    o_ref[...] = (acc + b_ref[...]).astype(o_ref.dtype)


def torch_model_forward(x, weight, bias, *, pack=16, tile_rows=4096,
                        out_dtype=jnp.float32):
    """Equivalent of TorchModel.forward: logits = x @ weight.T + bias.

    x:      [B, D]   float32 or bfloat16
    weight: [9, D]   float32  (PyTorch nn.Linear layout)
    bias:   [9]      float32
    returns [B, 9]   out_dtype (default float32; pass bf16 to shrink output
                     HBM traffic if downstream softmax/CE tolerates it)
    """
    B, D = x.shape
    n_out, D_w = weight.shape
    assert D_w == D, "weight/input feature mismatch"

    # ---- host-side (one-time) parameter prep: block-diagonal W^T, tiled bias
    # MXU is bf16-native; only cast the tiny weight, never the big activation.
    w_dtype = jnp.bfloat16 if x.dtype == jnp.bfloat16 else jnp.float32
    w_bd = jnp.kron(jnp.eye(pack, dtype=w_dtype),
                    weight.T.astype(w_dtype))          # (pack*D, pack*n_out)
    b_tiled = jnp.tile(bias.reshape(1, n_out).astype(jnp.float32),
                       (1, pack))                       # (1, pack*n_out)

    # ---- pad batch to a multiple of pack, then lane-pack rows
    B_pad = _round_up(B, pack)
    if B_pad != B:
        x = jnp.pad(x, ((0, B_pad - B), (0, 0)))
    R = B_pad // pack
    x_packed = x.reshape(R, pack * D)                   # 512 lanes for D=32

    # ---- tile selection
    tile_rows = min(tile_rows, R)
    if tile_rows < R:
        tile_rows = max(8, (tile_rows // 8) * 8)        # sublane multiple
    elif R >= 16:
        # Whole batch fits in one tile: split in two so the "parallel" grid
        # can be sharded across v7x's 2 TensorCores.
        tile_rows = min(R, _round_up(-(-R // 2), 8))
    grid = (pl.cdiv(R, tile_rows),)

    k_in = pack * D
    k_out = pack * n_out

    # ---- explicit VMEM budget: double-buffered, lane-padded x + out tiles
    tr = _round_up(tile_rows, 8)
    x_tile_bytes = tr * _round_up(k_in, 128) * x.dtype.itemsize
    o_tile_bytes = tr * _round_up(k_out, 128) * jnp.dtype(out_dtype).itemsize
    w_bytes = _round_up(k_in, 8) * _round_up(k_out, 128) * jnp.dtype(w_dtype).itemsize
    vmem_limit = 2 * (x_tile_bytes + o_tile_bytes) + 2 * w_bytes + (2 << 20)
    vmem_limit = int(min(max(vmem_limit, 16 << 20), 56 << 20))  # safe on v7x 64 MiB/TC

    out_packed = pl.pallas_call(
        _linear_kernel,
        out_shape=jax.ShapeDtypeStruct((R, k_out), out_dtype),
        grid_spec=pltpu.PrefetchScalarGridSpec(
            num_scalar_prefetch=0,
            grid=grid,
            in_specs=[
                pl.BlockSpec((tile_rows, k_in), lambda i: (i, 0)),  # streamed x
                pl.BlockSpec((k_in, k_out), lambda i: (0, 0)),      # resident W
                pl.BlockSpec((1, k_out), lambda i: (0, 0)),         # resident b
            ],
            out_specs=pl.BlockSpec((tile_rows, k_out), lambda i: (i, 0)),
        ),
        compiler_params=pltpu.CompilerParams(
            dimension_semantics=("parallel",),   # independent batch tiles -> megacore
            vmem_limit_bytes=vmem_limit,
        ),
    )(x_packed, w_bd, b_tiled)

    return out_packed.reshape(B_pad, n_out)[:B]


if __name__ == "__main__":
    # Small shapes consistent with the module: batch=8, input_size=32, out=9
    input_size = 32
    batch = 8
    n_classes = 9

    key = jax.random.PRNGKey(0)
    kx, kw, kb = jax.random.split(key, 3)

    x = jax.random.normal(kx, (batch, input_size), dtype=jnp.float32)

    # Deterministic init mirroring nn.Linear default: U(-1/sqrt(D), 1/sqrt(D))
    bound = 1.0 / jnp.sqrt(jnp.float32(input_size))
    weight = jax.random.uniform(kw, (n_classes, input_size), jnp.float32,
                                minval=-bound, maxval=bound)
    bias = jax.random.uniform(kb, (n_classes,), jnp.float32,
                              minval=-bound, maxval=bound)

    # --- tiny f32 batch: exact check against plain-JAX reference ------------
    logits = torch_model_forward(x, weight, bias)
    jax.block_until_ready(logits)
    ref = x @ weight.T + bias
    assert logits.shape == (batch, n_classes)
    assert jnp.allclose(logits, ref, atol=1e-5, rtol=1e-5)

    # --- multi-tile + non-multiple-of-pack batch + partial last tile --------
    B2 = 1000
    x2 = jax.random.normal(jax.random.PRNGKey(1), (B2, input_size), jnp.float32)
    out2 = torch_model_forward(x2, weight, bias, tile_rows=16)   # grid of 4
    jax.block_until_ready(out2)
    ref2 = x2 @ weight.T + bias
    assert out2.shape == (B2, n_classes)
    assert jnp.allclose(out2, ref2, atol=1e-5, rtol=1e-5)

    # --- bf16 activations arriving from upstream: bf16 x bf16 MXU, f32 acc --
    # (intentional accuracy trade vs PyTorch f32 nn.Linear; no wrapper-side
    # cast of f32 inputs is ever performed.)
    x3 = x2.astype(jnp.bfloat16)
    out3 = torch_model_forward(x3, weight, bias)
    jax.block_until_ready(out3)
    ref3 = x3.astype(jnp.float32) @ weight.T + bias
    assert jnp.allclose(out3, ref3, atol=5e-2, rtol=5e-2)

    print("KERNEL_OK")
</pallas_src>

<mosaic_0001>
module attributes {stable_mosaic.version = 11 : i64} {
  func.func @_linear_kernel(%arg0: i32, %arg1: memref<1x512xf32, #tpu.memory_space<vmem>>, %arg2: memref<512x144xf32, #tpu.memory_space<vmem>>, %arg3: memref<1x144xf32, #tpu.memory_space<vmem>>, %arg4: memref<1x144xf32, #tpu.memory_space<vmem>>) attributes {dimension_semantics = [#tpu.dimension_semantics<parallel>], iteration_bounds = array<i64: 1>, scalar_prefetch = 0 : i64, scratch_operands = 0 : i64, tpu.core_type = #tpu.core_type<tc>, window_params = [{transform_indices = @transform_0, window_bounds = array<i64: 1, 512>}, {pipeline_mode = #tpu.pipeline_mode<synchronous>, transform_indices = @transform_1, window_bounds = array<i64: 512, 144>}, {pipeline_mode = #tpu.pipeline_mode<synchronous>, transform_indices = @transform_2, window_bounds = array<i64: 1, 144>}, {transform_indices = @transform_3, window_bounds = array<i64: 1, 144>}]} {
    %c0 = arith.constant 0 : index
    %c0_0 = arith.constant 0 : index
    %0 = vector.load %arg1[%c0, %c0_0] : memref<1x512xf32, #tpu.memory_space<vmem>>, vector<1x512xf32>
    %c0_1 = arith.constant 0 : index
    %c0_2 = arith.constant 0 : index
    %1 = vector.load %arg2[%c0_1, %c0_2] : memref<512x144xf32, #tpu.memory_space<vmem>>, vector<512x144xf32>
    %cst = arith.constant dense<0.000000e+00> : vector<1x144xf32>
    %2 = tpu.matmul %0, %1, %cst {dimension_numbers = #tpu.dot_dimension_numbers<[1], [0], [0], [1], [0, 0, 1, 1], [], []>} : vector<1x512xf32>, vector<512x144xf32>, vector<1x144xf32> -> vector<1x144xf32>
    %c0_3 = arith.constant 0 : index
    %c0_4 = arith.constant 0 : index
    %3 = vector.load %arg3[%c0_3, %c0_4] : memref<1x144xf32, #tpu.memory_space<vmem>>, vector<1x144xf32>
    %4 = arith.addf %2, %3 : vector<1x144xf32>
    %c0_5 = arith.constant 0 : index
    %c0_6 = arith.constant 0 : index
    %5 = vector.load %arg4[%c0_5, %c0_6] : memref<1x144xf32, #tpu.memory_space<vmem>>, vector<1x144xf32>
    tpu.vector_store %arg4[%c0_5, %c0_6], %4 {strides = array<i32>} : memref<1x144xf32, #tpu.memory_space<vmem>>, vector<1x144xf32>,
    return
  }
  func.func @transform_0(%arg0: i32) -> (i32, i32) {
    %c0_i32 = arith.constant 0 : i32
    %c0_i32_0 = arith.constant 0 : i32
    return %arg0, %c0_i32 : i32, i32
  }
  func.func @transform_1(%arg0: i32) -> (i32, i32) {
    %c0_i32 = arith.constant 0 : i32
    %c0_i32_0 = arith.constant 0 : i32
    %c0_i32_1 = arith.constant 0 : i32
    return %c0_i32, %c0_i32_0 : i32, i32
  }
  func.func @transform_2(%arg0: i32) -> (i32, i32) {
    %c0_i32 = arith.constant 0 : i32
    %c0_i32_0 = arith.constant 0 : i32
    %c0_i32_1 = arith.constant 0 : i32
    return %c0_i32, %c0_i32_0 : i32, i32
  }
  func.func @transform_3(%arg0: i32) -> (i32, i32) {
    %c0_i32 = arith.constant 0 : i32
    %c0_i32_0 = arith.constant 0 : i32
    return %arg0, %c0_i32 : i32, i32
  }
}

</mosaic_0001>

<bundles_post_ra>
// kernel: tpu_custom_call.1
= control target key start
LH: loop header
LB: loop body
LE: loop exit
PB: predicated region body
PF: predicated region fallthrough
CT: control target
= control target key end

     0   :  { %s793_s0 = inlined_call_operand.vmem [shape: f32[1,512], index: 0, kind: input, shape index: {}]   ;;  %s794_s1 = inlined_call_operand.vmem [shape: f32[512,144], index: 1, kind: input, shape index: {}]   ;;  %s795_s2 = inlined_call_operand.vmem [shape: f32[1,144], index: 2, kind: input, shape index: {}]   ;;  %s796_s3 = inlined_call_operand.hbm [shape: f32[1,144], index: 3, kind: output, shape index: {}]  }
   0x1   :  { %v110_v0 = vld [vmem:[%s794_s1 + $0x2f0] sm:$0xff]  ;;  %v108_v2 = vld [vmem:[%s794_s1 + $0x2e0] sm:$0xff]  ;;  %v111_v62 = vld [vmem:[%s794_s1 + $0x2f8] sm:$0xff] }
   0x2   :  { %v46_v1 = vld [vmem:[%s794_s1 + $0xf0] sm:$0xff]  ;;  %199 = vmatpush.msra.mxu2 %v110_v0  ;;  %v44_v4 = vld [vmem:[%s794_s1 + $0xe0] sm:$0xff]  ;;  %v47_v0 = vld [vmem:[%s794_s1 + $0xf8] sm:$0xff] }
   0x3   :  { %159 = vmatpush.msra.mxu0 %v46_v1  ;;  %v142_v3 = vld [vmem:[%s794_s1 + $0x3f0] sm:$0xff]  ;;  %v140_v7 = vld [vmem:[%s794_s1 + $0x3e0] sm:$0xff]  ;;  %v143_v1 = vld [vmem:[%s794_s1 + $0x3f8] sm:$0xff] }
   0x4   :  { %v78_v5 = vld [vmem:[%s794_s1 + $0x1f0] sm:$0xff]  ;;  %219 = vmatpush.msra.mxu3 %v142_v3  ;;  %200 = vmatpush.msra.mxu2 %v108_v2  ;;  %v76_v9 = vld [vmem:[%s794_s1 + $0x1e0] sm:$0xff]  ;;  %v109_v2 = vld [vmem:[%s794_s1 + $0x2e8] sm:$0xff] }
   0x5   :  { %179 = vmatpush.msra.mxu1 %v78_v5  ;;  %v106_v6 = vld [vmem:[%s794_s1 + $0x2d0] sm:$0xff]  ;;  %160 = vmatpush.msra.mxu0 %v44_v4  ;;  %v104_v11 = vld [vmem:[%s794_s1 + $0x2c0] sm:$0xff]  ;;  %v45_v4 = vld [vmem:[%s794_s1 + $0xe8] sm:$0xff] }
   0x6   :  { %v42_v8 = vld [vmem:[%s794_s1 + $0xd0] sm:$0xff]  ;;  %220 = vmatpush.msra.mxu3 %v140_v7  ;;  %v40_v12 = vld [vmem:[%s794_s1 + $0xc0] sm:$0xff]  ;;  %201 = vmatpush.msra.mxu2 %v106_v6  ;;  %v79_v5 = vld [vmem:[%s794_s1 + $0x1f8] sm:$0xff] }
   0x7   :  { %v138_v10 = vld [vmem:[%s794_s1 + $0x3d0] sm:$0xff]  ;;  %180 = vmatpush.msra.mxu1 %v76_v9  ;;  %161 = vmatpush.msra.mxu0 %v42_v8  ;;  %v136_v14 = vld [vmem:[%s794_s1 + $0x3c0] sm:$0xff]  ;;  %v107_v6 = vld [vmem:[%s794_s1 + $0x2d8] sm:$0xff] }
   0x8   :  { %v74_v13 = vld [vmem:[%s794_s1 + $0x1d0] sm:$0xff]  ;;  %v72_v15 = vld [vmem:[%s794_s1 + $0x1c0] sm:$0xff]  ;;  %221 = vmatpush.msra.mxu3 %v138_v10  ;;  %202 = vmatpush.msra.mxu2 %v104_v11  ;;  %v141_v7 = vld [vmem:[%s794_s1 + $0x3e8] sm:$0xff] }
   0x9   :  { %181 = vmatpush.msra.mxu1 %v74_v13  ;;  %v102_v16 = vld [vmem:[%s794_s1 + $0x2b0] sm:$0xff]  ;;  %162 = vmatpush.msra.mxu0 %v40_v12  ;;  %v100_v20 = vld [vmem:[%s794_s1 + $0x2a0] sm:$0xff]  ;;  %v43_v8 = vld [vmem:[%s794_s1 + $0xd8] sm:$0xff] }
   0xa   :  { %v38_v17 = vld [vmem:[%s794_s1 + $0xb0] sm:$0xff]  ;;  %222 = vmatpush.msra.mxu3 %v136_v14  ;;  %v36_v21 = vld [vmem:[%s794_s1 + $0xa0] sm:$0xff]  ;;  %203 = vmatpush.msra.mxu2 %v102_v16  ;;  %v77_v9 = vld [vmem:[%s794_s1 + $0x1e8] sm:$0xff] }
   0xb   :  { %v134_v18 = vld [vmem:[%s794_s1 + $0x3b0] sm:$0xff]  ;;  %182 = vmatpush.msra.mxu1 %v72_v15  ;;  %163 = vmatpush.msra.mxu0 %v38_v17  ;;  %v132_v22 = vld [vmem:[%s794_s1 + $0x3a0] sm:$0xff]  ;;  %v105_v10 = vld [vmem:[%s794_s1 + $0x2c8] sm:$0xff] }
   0xc   :  { %v70_v19 = vld [vmem:[%s794_s1 + $0x1b0] sm:$0xff]  ;;  %v68_v23 = vld [vmem:[%s794_s1 + $0x1a0] sm:$0xff]  ;;  %223 = vmatpush.msra.mxu3 %v134_v18  ;;  %204 = vmatpush.msra.mxu2 %v100_v20  ;;  %v139_v11 = vld [vmem:[%s794_s1 + $0x3d8] sm:$0xff] }
   0xd   :  { %183 = vmatpush.msra.mxu1 %v70_v19  ;;  %v98_v24 = vld [vmem:[%s794_s1 + $0x290] sm:$0xff]  ;;  %164 = vmatpush.msra.mxu0 %v36_v21  ;;  %v96_v28 = vld [vmem:[%s794_s1 + $0x280] sm:$0xff]  ;;  %v41_v12 = vld [vmem:[%s794_s1 + $0xc8] sm:$0xff] }
   0xe   :  { %v34_v25 = vld [vmem:[%s794_s1 + $0x90] sm:$0xff]  ;;  %224 = vmatpush.msra.mxu3 %v132_v22  ;;  %v32_v29 = vld [vmem:[%s794_s1 + $0x80] sm:$0xff]  ;;  %205 = vmatpush.msra.mxu2 %v98_v24  ;;  %v75_v13 = vld [vmem:[%s794_s1 + $0x1d8] sm:$0xff] }
   0xf   :  { %v130_v26 = vld [vmem:[%s794_s1 + $0x390] sm:$0xff]  ;;  %184 = vmatpush.msra.mxu1 %v68_v23  ;;  %165 = vmatpush.msra.mxu0 %v34_v25  ;;  %v128_v30 = vld [vmem:[%s794_s1 + $0x380] sm:$0xff]  ;;  %v103_v14 = vld [vmem:[%s794_s1 + $0x2b8] sm:$0xff] }
  0x10   :  { %v66_v27 = vld [vmem:[%s794_s1 + $0x190] sm:$0xff]  ;;  %v64_v31 = vld [vmem:[%s794_s1 + $0x180] sm:$0xff]  ;;  %225 = vmatpush.msra.mxu3 %v130_v26  ;;  %206 = vmatpush.msra.mxu2 %v96_v28  ;;  %v137_v15 = vld [vmem:[%s794_s1 + $0x3c8] sm:$0xff] }
  0x11   :  { %185 = vmatpush.msra.mxu1 %v66_v27  ;;  %v94_v32 = vld [vmem:[%s794_s1 + $0x270] sm:$0xff]  ;;  %166 = vmatpush.msra.mxu0 %v32_v29  ;;  %v92_v36 = vld [vmem:[%s794_s1 + $0x260] sm:$0xff]  ;;  %v39_v16 = vld [vmem:[%s794_s1 + $0xb8] sm:$0xff] }
  0x12   :  { %v30_v33 = vld [vmem:[%s794_s1 + $0x70] sm:$0xff]  ;;  %226 = vmatpush.msra.mxu3 %v128_v30  ;;  %v28_v37 = vld [vmem:[%s794_s1 + $0x60] sm:$0xff]  ;;  %207 = vmatpush.msra.mxu2 %v94_v32  ;;  %v73_v17 = vld [vmem:[%s794_s1 + $0x1c8] sm:$0xff] }
  0x13   :  { %v126_v34 = vld [vmem:[%s794_s1 + $0x370] sm:$0xff]  ;;  %186 = vmatpush.msra.mxu1 %v64_v31  ;;  %167 = vmatpush.msra.mxu0 %v30_v33  ;;  %v124_v38 = vld [vmem:[%s794_s1 + $0x360] sm:$0xff]  ;;  %v101_v18 = vld [vmem:[%s794_s1 + $0x2a8] sm:$0xff] }
  0x14   :  { %v62_v35 = vld [vmem:[%s794_s1 + $0x170] sm:$0xff]  ;;  %v60_v39 = vld [vmem:[%s794_s1 + $0x160] sm:$0xff]  ;;  %227 = vmatpush.msra.mxu3 %v126_v34  ;;  %208 = vmatpush.msra.mxu2 %v92_v36  ;;  %v135_v19 = vld [vmem:[%s794_s1 + $0x3b8] sm:$0xff] }
  0x15   :  { %187 = vmatpush.msra.mxu1 %v62_v35  ;;  %v90_v40 = vld [vmem:[%s794_s1 + $0x250] sm:$0xff]  ;;  %168 = vmatpush.msra.mxu0 %v28_v37  ;;  %v88_v44 = vld [vmem:[%s794_s1 + $0x240] sm:$0xff]  ;;  %v37_v20 = vld [vmem:[%s794_s1 + $0xa8] sm:$0xff] }
  0x16   :  { %v26_v41 = vld [vmem:[%s794_s1 + $0x50] sm:$0xff]  ;;  %228 = vmatpush.msra.mxu3 %v124_v38  ;;  %v24_v45 = vld [vmem:[%s794_s1 + $0x40] sm:$0xff]  ;;  %209 = vmatpush.msra.mxu2 %v90_v40  ;;  %v71_v21 = vld [vmem:[%s794_s1 + $0x1b8] sm:$0xff] }
  0x17   :  { %v122_v42 = vld [vmem:[%s794_s1 + $0x350] sm:$0xff]  ;;  %188 = vmatpush.msra.mxu1 %v60_v39  ;;  %169 = vmatpush.msra.mxu0 %v26_v41  ;;  %v120_v46 = vld [vmem:[%s794_s1 + $0x340] sm:$0xff]  ;;  %v99_v22 = vld [vmem:[%s794_s1 + $0x298] sm:$0xff] }
  0x18   :  { %v58_v43 = vld [vmem:[%s794_s1 + $0x150] sm:$0xff]  ;;  %v56_v47 = vld [vmem:[%s794_s1 + $0x140] sm:$0xff]  ;;  %229 = vmatpush.msra.mxu3 %v122_v42  ;;  %210 = vmatpush.msra.mxu2 %v88_v44  ;;  %v133_v23 = vld [vmem:[%s794_s1 + $0x3a8] sm:$0xff] }
  0x19   :  { %189 = vmatpush.msra.mxu1 %v58_v43  ;;  %v86_v48 = vld [vmem:[%s794_s1 + $0x230] sm:$0xff]  ;;  %170 = vmatpush.msra.mxu0 %v24_v45  ;;  %v84_v52 = vld [vmem:[%s794_s1 + $0x220] sm:$0xff]  ;;  %v35_v24 = vld [vmem:[%s794_s1 + $0x98] sm:$0xff] }
  0x1a   :  { %v22_v49 = vld [vmem:[%s794_s1 + $0x30] sm:$0xff]  ;;  %230 = vmatpush.msra.mxu3 %v120_v46  ;;  %v20_v53 = vld [vmem:[%s794_s1 + $0x20] sm:$0xff]  ;;  %211 = vmatpush.msra.mxu2 %v86_v48  ;;  %v69_v25 = vld [vmem:[%s794_s1 + $0x1a8] sm:$0xff] }
  0x1b   :  { %v118_v50 = vld [vmem:[%s794_s1 + $0x330] sm:$0xff]  ;;  %190 = vmatpush.msra.mxu1 %v56_v47  ;;  %171 = vmatpush.msra.mxu0 %v22_v49  ;;  %v116_v54 = vld [vmem:[%s794_s1 + $0x320] sm:$0xff]  ;;  %v97_v26 = vld [vmem:[%s794_s1 + $0x288] sm:$0xff] }
  0x1c   :  { %v54_v51 = vld [vmem:[%s794_s1 + $0x130] sm:$0xff]  ;;  %v52_v55 = vld [vmem:[%s794_s1 + $0x120] sm:$0xff]  ;;  %231 = vmatpush.msra.mxu3 %v118_v50  ;;  %212 = vmatpush.msra.mxu2 %v84_v52  ;;  %v131_v27 = vld [vmem:[%s794_s1 + $0x398] sm:$0xff] }
  0x1d   :  { %191 = vmatpush.msra.mxu1 %v54_v51  ;;  %v82_v56 = vld [vmem:[%s794_s1 + $0x210] sm:$0xff]  ;;  %172 = vmatpush.msra.mxu0 %v20_v53  ;;  %v80_v60 = vld [vmem:[%s794_s1 + $0x200] sm:$0xff] }
  0x1e   :  { %v18_v57 = vld [vmem:[%s794_s1 + $0x10] sm:$0xff]  ;;  %232 = vmatpush.msra.mxu3 %v116_v54  ;;  %v16_v61 = vld [vmem:[%s794_s1] sm:$0xff]  ;;  %213 = vmatpush.msra.mxu2 %v82_v56 }
  0x1f   :  { %v114_v58 = vld [vmem:[%s794_s1 + $0x310] sm:$0xff]  ;;  %192 = vmatpush.msra.mxu1 %v52_v55  ;;  %173 = vmatpush.msra.mxu0 %v18_v57  ;;  %v112_v63 = vld [vmem:[%s794_s1 + $0x300] sm:$0xff] }
  0x20   :  { %v50_v59 = vld [vmem:[%s794_s1 + $0x110] sm:$0xff]  ;;  %233 = vmatpush.msra.mxu3 %v114_v58  ;;  %214 = vmatpush.msra.mxu2 %v80_v60  ;;  %v48_v3 = vld [vmem:[%s794_s1 + $0x100] sm:$0xff] }
  0x21   :  { %193 = vmatpush.msra.mxu1 %v50_v59  ;;  %174 = vmatpush.msra.mxu0 %v16_v61 }
  0x22   :  { %279 = vmatpush.msrb.mxu2 %v111_v62  ;;  %234 = vmatpush.msra.mxu3 %v112_v63 }
  0x23   :  { %239 = vmatpush.msrb.mxu0 %v47_v0  ;;  %194 = vmatpush.msra.mxu1 %v48_v3 }
  0x24   :  { %299 = vmatpush.msrb.mxu3 %v143_v1  ;;  %280 = vmatpush.msrb.mxu2 %v109_v2 }
  0x25   :  { %240 = vmatpush.msrb.mxu0 %v45_v4  ;;  %259 = vmatpush.msrb.mxu1 %v79_v5 }
  0x26   :  { %281 = vmatpush.msrb.mxu2 %v107_v6  ;;  %300 = vmatpush.msrb.mxu3 %v141_v7 }
  0x27   :  { %241 = vmatpush.msrb.mxu0 %v43_v8  ;;  %260 = vmatpush.msrb.mxu1 %v77_v9 }
  0x28   :  { %282 = vmatpush.msrb.mxu2 %v105_v10  ;;  %301 = vmatpush.msrb.mxu3 %v139_v11 }
  0x29   :  { %242 = vmatpush.msrb.mxu0 %v41_v12  ;;  %261 = vmatpush.msrb.mxu1 %v75_v13 }
  0x2a   :  { %283 = vmatpush.msrb.mxu2 %v103_v14  ;;  %302 = vmatpush.msrb.mxu3 %v137_v15 }
  0x2b   :  { %243 = vmatpush.msrb.mxu0 %v39_v16  ;;  %262 = vmatpush.msrb.mxu1 %v73_v17 }
  0x2c   :  { %284 = vmatpush.msrb.mxu2 %v101_v18  ;;  %303 = vmatpush.msrb.mxu3 %v135_v19 }
  0x2d   :  { %244 = vmatpush.msrb.mxu0 %v37_v20  ;;  %263 = vmatpush.msrb.mxu1 %v71_v21 }
  0x2e   :  { %8 = vsyncpa [#allocation3], 0  ;;  %285 = vmatpush.msrb.mxu2 %v99_v22  ;;  %304 = vmatpush.msrb.mxu3 %v133_v23  ;;  %v33_v28 = vld [vmem:[%s794_s1 + $0x88] sm:$0xff]  ;;  %v67_v29 = vld [vmem:[%s794_s1 + $0x198] sm:$0xff]  ;;  %v325_v21 = vlaneseq  ;;  %s337_s29 = sshll.u32 %s796_s3, 4  ;;  %vm322_vm0 = vcmask 1040384   ;;  %s338_s29 = int_to_ptr.hbm [resolvable:$true] %s337_s29 }
  0x2f   :  { %245 = vmatpush.msrb.mxu0 %v35_v24  ;;  %264 = vmatpush.msrb.mxu1 %v69_v25  ;;  %v95_v30 = vld [vmem:[%s794_s1 + $0x278] sm:$0xff]  ;;  %v129_v31 = vld [vmem:[%s794_s1 + $0x388] sm:$0xff]  ;;  %v703_v38 = vld [vmem:[%s793_s0] sm:$0xf] }
  0x30   :  { %286 = vmatpush.msrb.mxu2 %v97_v26  ;;  %305 = vmatpush.msrb.mxu3 %v131_v27  ;;  %v31_v32 = vld [vmem:[%s794_s1 + $0x78] sm:$0xff]  ;;  %v65_v33 = vld [vmem:[%s794_s1 + $0x188] sm:$0xff]  ;;  %v148_v45 = vperm.slane %v703_v38, 2  ;;  %v146_v49 = vperm.slane %v703_v38, 0  ;;  %v149_v51 = vperm.slane %v703_v38, 3  ;;  %v147_v55 = vperm.slane %v703_v38, 1 }
  0x31   :  { %246 = vmatpush.msrb.mxu0 %v33_v28  ;;  %265 = vmatpush.msrb.mxu1 %v67_v29  ;;  %v93_v34 = vld [vmem:[%s794_s1 + $0x268] sm:$0xff]  ;;  %v127_v35 = vld [vmem:[%s794_s1 + $0x378] sm:$0xff]  ;;  %v144_v5 = vld [vmem:[%s795_s2] sm:$0x3]  ;;  %vm327_vm1 = vcmp.lt.s32.totalorder %v325_v21, 144 }
  0x32   :  { %287 = vmatpush.msrb.mxu2 %v95_v30  ;;  %306 = vmatpush.msrb.mxu3 %v129_v31  ;;  %v29_v36 = vld [vmem:[%s794_s1 + $0x68] sm:$0xff]  ;;  %v63_v37 = vld [vmem:[%s794_s1 + $0x178] sm:$0xff]  ;;  %v155_v7 = vperm.slane %v144_v5, 0  ;;  %v156_v12 = vperm.slane %v144_v5, 1 }
  0x33   :  { %247 = vmatpush.msrb.mxu0 %v31_v32  ;;  %266 = vmatpush.msrb.mxu1 %v65_v33  ;;  %v91_v39 = vld [vmem:[%s794_s1 + $0x258] sm:$0xff]  ;;  %v125_v40 = vld [vmem:[%s794_s1 + $0x368] sm:$0xff] }
  0x34   :  { %288 = vmatpush.msrb.mxu2 %v93_v34  ;;  %307 = vmatpush.msrb.mxu3 %v127_v35  ;;  %v27_v41 = vld [vmem:[%s794_s1 + $0x58] sm:$0xff]  ;;  %v61_v42 = vld [vmem:[%s794_s1 + $0x168] sm:$0xff] }
  0x35   :  { %248 = vmatpush.msrb.mxu0 %v29_v36  ;;  %267 = vmatpush.msrb.mxu1 %v63_v37  ;;  %v89_v43 = vld [vmem:[%s794_s1 + $0x248] sm:$0xff]  ;;  %v123_v44 = vld [vmem:[%s794_s1 + $0x358] sm:$0xff] }
  0x36   :  { %289 = vmatpush.msrb.mxu2 %v91_v39  ;;  %308 = vmatpush.msrb.mxu3 %v125_v40  ;;  %v25_v46 = vld [vmem:[%s794_s1 + $0x48] sm:$0xff]  ;;  %v59_v47 = vld [vmem:[%s794_s1 + $0x158] sm:$0xff] }
  0x37   :  { %249 = vmatpush.msrb.mxu0 %v27_v41  ;;  %268 = vmatpush.msrb.mxu1 %v61_v42  ;;  %v87_v48 = vld [vmem:[%s794_s1 + $0x238] sm:$0xff]  ;;  %v121_v50 = vld [vmem:[%s794_s1 + $0x348] sm:$0xff] }
  0x38   :  { %290 = vmatpush.msrb.mxu2 %v89_v43  ;;  %309 = vmatpush.msrb.mxu3 %v123_v44  ;;  %v23_v52 = vld [vmem:[%s794_s1 + $0x38] sm:$0xff]  ;;  %v57_v53 = vld [vmem:[%s794_s1 + $0x148] sm:$0xff] }
  0x39   :  { %215 = vmatmul.f32.vlgmr.msra.gmra.mxu2 %v148_v45  ;;  %250 = vmatpush.msrb.mxu0 %v25_v46  ;;  %v85_v54 = vld [vmem:[%s794_s1 + $0x228] sm:$0xff]  ;;  %v119_v56 = vld [vmem:[%s794_s1 + $0x338] sm:$0xff] }
  0x3a   :  { %269 = vmatpush.msrb.mxu1 %v59_v47  ;;  %291 = vmatpush.msrb.mxu2 %v87_v48  ;;  %v21_v57 = vld [vmem:[%s794_s1 + $0x28] sm:$0xff]  ;;  %v55_v58 = vld [vmem:[%s794_s1 + $0x138] sm:$0xff] }
  0x3b   :  { %310 = vmatpush.msrb.mxu3 %v121_v50  ;;  %175 = vmatmul.f32.vlgmr.msra.gmra.mxu0 %v146_v49  ;;  %v83_v59 = vld [vmem:[%s794_s1 + $0x218] sm:$0xff]  ;;  %v117_v60 = vld [vmem:[%s794_s1 + $0x328] sm:$0xff] }
  0x3c   :  { %235 = vmatmul.f32.vlgmr.msra.gmra.mxu3 %v149_v51  ;;  %251 = vmatpush.msrb.mxu0 %v23_v52  ;;  %v19_v61 = vld [vmem:[%s794_s1 + $0x18] sm:$0xff]  ;;  %v53_v62 = vld [vmem:[%s794_s1 + $0x128] sm:$0xff] }
  0x3d   :  { %270 = vmatpush.msrb.mxu1 %v57_v53  ;;  %292 = vmatpush.msrb.mxu2 %v85_v54  ;;  %v81_v63 = vld [vmem:[%s794_s1 + $0x208] sm:$0xff]  ;;  %v115_v0 = vld [vmem:[%s794_s1 + $0x318] sm:$0xff] }
  0x3e   :  { %311 = vmatpush.msrb.mxu3 %v119_v56  ;;  %195 = vmatmul.f32.vlgmr.msra.gmra.mxu1 %v147_v55  ;;  %v17_v1 = vld [vmem:[%s794_s1 + $0x8] sm:$0xff]  ;;  %v51_v2 = vld [vmem:[%s794_s1 + $0x118] sm:$0xff] }
  0x3f   :  { %252 = vmatpush.msrb.mxu0 %v21_v57  ;;  %271 = vmatpush.msrb.mxu1 %v55_v58  ;;  %v113_v3 = vld [vmem:[%s794_s1 + $0x308] sm:$0xff] }
  0x40   :  { %293 = vmatpush.msrb.mxu2 %v83_v59  ;;  %312 = vmatpush.msrb.mxu3 %v117_v60  ;;  %v49_v4 = vld [vmem:[%s794_s1 + $0x108] sm:$0xff]  ;;  %s373_s1 = smov [#allocation2]  }
  0x41   :  { %253 = vmatpush.msrb.mxu0 %v19_v61  ;;  %272 = vmatpush.msrb.mxu1 %v53_v62  ;;  %s335_s2 = sshll.u32 %s373_s1, 4  ;;  %s336_s2 = int_to_ptr.vmem [resolvable:$true] %s335_s2 }
  0x42   :  { %294 = vmatpush.msrb.mxu2 %v81_v63  ;;  %313 = vmatpush.msrb.mxu3 %v115_v0 }
  0x43   :  { %295 = vmatmul.f32.vlgmr.msrb.gmra.mxu2 %v148_v45  ;;  %254 = vmatpush.msrb.mxu0 %v17_v1 }
  0x44   :  { %273 = vmatpush.msrb.mxu1 %v51_v2  ;;  %314 = vmatpush.msrb.mxu3 %v113_v3 }
  0x45   :  { %255 = vmatmul.f32.vlgmr.msrb.gmra.mxu0 %v146_v49  ;;  %315 = vmatmul.f32.vlgmr.msrb.gmra.mxu3 %v149_v51 }
  0x46   :  { %274 = vmatpush.msrb.mxu1 %v49_v4 }
  0x47   :  { %275 = vmatmul.f32.vlgmr.msrb.gmra.mxu1 %v147_v55 }
  0xb8   :  { %v176_v6 = vpop.f32.mrf.mxu0 }
  0xb9   :  { %v177_v10 = vadd.f32 %v176_v6, %v155_v7 }
  0xbb   :  { %v196_v8 = vpop.f32.mrf.mxu1 }
  0xbc   :  { %v216_v9 = vpop.f32.mrf.mxu2  ;;  %v197_v14 = vadd.f32 %v196_v8, %v177_v10 }
  0xbe   :  { %v217_v19 = vadd.f32 %v216_v9, %v197_v14 }
  0xbf   :  { %v236_v11 = vpop.f32.mrf.mxu3 }
  0xc0   :  { %v237_v24 = vadd.f32 %v236_v11, %v217_v19 }
  0xc2   :  { %v256_v13 = vpop.f32.mrf.mxu0 }
  0xc3   :  { %v257_v15 = vadd.f32 %v256_v13, %v156_v12 }
  0xc4   :  { %v276_v16 = vpop.f32.mrf.mxu1 }
  0xc5   :  { %v277_v17 = vadd.f32 %v276_v16, %v257_v15 }
  0xc6   :  { %v296_v18 = vpop.f32.mrf.mxu2 }
  0xc7   :  { %v297_v20 = vadd.f32 %v296_v18, %v277_v17 }
  0xc8   :  { %v316_v22 = vpop.f32.mrf.mxu3 }
  0xc9   :  { %v317_v23 = vadd.f32 %v316_v22, %v297_v20 }
  0xcb   :  { %v321_v25 = vrot.slane %v317_v23, 7 }
  0xcd   :  { %v323_v26 = vsel %vm322_vm0, %v237_v24, %v321_v25 }
  0xce   :  { %329 = vst.msk [vmem:[#allocation2] sm:$0x3] %vm327_vm1, %v323_v26 }
  0xcf   :  { %340 = dma.vmem_to_hbm [thread:$0]  %s336_s2, 32, %s338_s29, [#allocation3]  }
  0xd0   :  { %371 = dma.done.wait [#allocation3], 32  }
  0xd1   :  { %372 = vsyncadd [#allocation3], 4294967264 }
  0xd2   :  { %345 = vsyncpa [#allocation3], 1 }

</bundles_post_ra>
